<compile_context>
chip_gen: v7x
topology: tpu7x:2x2x1
jax: 0.10.0
libtpu: 0.0.40
codegen_flags: <defaults>
</compile_context>

<pallas_src>
import functools

import jax
import jax.numpy as jnp
import numpy as np
from jax.experimental import pallas as pl
from jax.experimental.pallas import tpu as pltpu

BN_EPS = 1e-5
_LANE = 128
_MiB = 1024 * 1024


# ---------------------------------------------------------------------------
# Tiling / VMEM sizing helpers (all trace-time Python on static shapes).
# ---------------------------------------------------------------------------
def _round_up(a, b):
    return ((a + b - 1) // b) * b


def _apply_tile_target():
    """Generation-aware M-tile target (lanes).

    v5e (~0.8 TB/s HBM) is already >90% of its roofline at ~16K lanes; v6e/v7x
    (1.3 / 3.2 TB/s) need ~32K lanes to amortize the ~0.35us per-step overhead.
    """
    try:
        kind = jax.devices()[0].device_kind.lower()
    except Exception:  # pragma: no cover - defensive, e.g. interpret mode
        kind = ""
    if "v5 lite" in kind or "v5e" in kind or "v5lite" in kind:
        return 16384
    return 32768


def _choose_tiles(msp, target):
    """Apply-sweep tile (multiple of 128, <= target, near-equal split of msp),
    stats-sweep tile (1-2x larger), and the padded M extent shared by both."""
    nt = max(1, -(-msp // target))                      # cdiv
    t_apply = _round_up(-(-msp // nt), _LANE)           # near-equal, lane-aligned
    padded = _round_up(msp, t_apply)
    nt = padded // t_apply
    # Stats sweep only moves cin*4 B/voxel -> use a bigger tile when possible.
    k = 2 if (nt % 2 == 0 and 2 * t_apply <= 65536) else 1
    return t_apply, k * t_apply, padded


def _vmem_limit(tile_bytes_estimate):
    # Generous headroom over the estimated per-step footprint, but stay within
    # ~75% of v7x's 64 MiB physical VMEM (v5e/v6e have 128 MiB physical).
    return int(min(48 * _MiB, max(32 * _MiB, 2 * tile_bytes_estimate)))


# ---------------------------------------------------------------------------
# Kernels. Channels-first blocks: x (1, Cin, T), out (1, Cout, T).
# ---------------------------------------------------------------------------
def _stats_kernel(x_ref, w1_ref, sum_ref, sq_ref):
    """Per-tile partial per-channel sum / sum-of-squares of h_raw = W1 @ x.

    No resident accumulator -> both grid axes are 'parallel'.  The lane-group
    accumulation inside jnp.sum is VALU work; only the final 128-lane reduce
    touches the XLU once per step.
    """
    x = x_ref[0].astype(jnp.bfloat16)                        # (Cin, T)
    raw = jnp.dot(w1_ref[...], x,                            # (Chid, T), f32 acc
                  preferred_element_type=jnp.float32)
    sum_ref[0, 0] = jnp.sum(raw, axis=1, keepdims=True)      # (Chid, 1)
    sq_ref[0, 0] = jnp.sum(raw * raw, axis=1, keepdims=True)


def _apply_kernel(x_ref, w1_ref, scale_ref, shift_ref, w2_ref, b2_ref, o_ref):
    """y = W2 @ relu((W1 @ x) * scale + shift) + b2 (bias+BN+affine folded)."""
    x = x_ref[0].astype(jnp.bfloat16)                        # (Cin, T)
    raw = jnp.dot(w1_ref[...], x, preferred_element_type=jnp.float32)
    h = raw * scale_ref[...] + shift_ref[...]                # per-channel FMA (f32)
    h = jnp.maximum(h, 0.0).astype(jnp.bfloat16)
    y = jnp.dot(w2_ref[...], h, preferred_element_type=jnp.float32) + b2_ref[...]
    o_ref[0] = y.astype(o_ref.dtype)                         # lane-dense (Cout, T)


def _linear_kernel(x_ref, w_ref, b_ref, o_ref):
    x = x_ref[0].astype(jnp.bfloat16)
    y = jnp.dot(w_ref[...], x, preferred_element_type=jnp.float32) + b_ref[...]
    o_ref[0] = y.astype(o_ref.dtype)


def _const_spec(shape):
    return pl.BlockSpec(shape, lambda i, j: (0,) * len(shape))


# ---------------------------------------------------------------------------
# Wrapper
# ---------------------------------------------------------------------------
@functools.partial(jax.jit, static_argnames=("mode",))
def projection_head_forward(x, params, mode="convmlp"):
    """x: (N, C_in, D, H, W) NCDHW like PyTorch.  Returns (N, C_out, D, H, W)."""
    if mode == "none":
        return x

    n, cin, d, hh, ww = x.shape
    msp = d * hh * ww
    t_apply, t_stats, padded = _choose_tiles(msp, _apply_tile_target())
    mt_a = padded // t_apply

    x_cm = x.reshape(n, cin, msp)                 # free view: channels-first
    if padded != msp:                             # tail handled by zero padding
        x_cm = jnp.pad(x_cm, ((0, 0), (0, 0), (0, padded - msp)))

    def x_spec(t):
        return pl.BlockSpec((1, cin, t), lambda i, j: (i, 0, j))

    x_bytes = n * cin * padded * 4

    if mode == "linear":
        w = params["w"].astype(jnp.bfloat16)                  # (Cout, Cin)
        b = params["b"].reshape(-1, 1).astype(jnp.float32)    # (Cout, 1)
        cout = w.shape[0]
        tile_bytes = t_apply * (2 * cin * 4 + 3 * cout * 4)
        y = pl.pallas_call(
            _linear_kernel,
            out_shape=jax.ShapeDtypeStruct((n, cout, padded), jnp.float32),
            grid_spec=pltpu.PrefetchScalarGridSpec(
                num_scalar_prefetch=0, grid=(n, mt_a),
                in_specs=[x_spec(t_apply), _const_spec(w.shape), _const_spec(b.shape)],
                out_specs=pl.BlockSpec((1, cout, t_apply), lambda i, j: (i, 0, j))),
            compiler_params=pltpu.CompilerParams(
                dimension_semantics=("parallel", "parallel"),
                vmem_limit_bytes=_vmem_limit(tile_bytes)),
            cost_estimate=pl.CostEstimate(
                flops=2 * n * padded * cin * cout, transcendentals=0,
                bytes_accessed=x_bytes + n * cout * padded * 4),
        )(x_cm, w, b)
        if padded != msp:
            y = y[:, :, :msp]
        return y.reshape(n, cout, d, hh, ww)

    # ---- convmlp: conv1x1 -> BatchNorm3d (batch stats) -> ReLU -> conv1x1 ----
    w1 = params["w1"].astype(jnp.bfloat16)                    # (Chid, Cin)
    w2 = params["w2"].astype(jnp.bfloat16)                    # (Cout, Chid)
    gamma = params["gamma"].reshape(-1, 1).astype(jnp.float32)
    beta = params["beta"].reshape(-1, 1).astype(jnp.float32)
    b2 = params["b2"].reshape(-1, 1).astype(jnp.float32)
    chid, cout = w1.shape[0], w2.shape[0]

    # Sweep 1: per-tile partial per-channel sum / sum-of-squares of W1 @ x.
    mt_s = padded // t_stats
    stat_spec = pl.BlockSpec((1, 1, chid, 1), lambda i, j: (i, j, 0, 0))
    stats_tile_bytes = t_stats * (2 * cin * 4 + 2 * chid * 4)
    sums, sqs = pl.pallas_call(
        _stats_kernel,
        out_shape=(jax.ShapeDtypeStruct((n, mt_s, chid, 1), jnp.float32),
                   jax.ShapeDtypeStruct((n, mt_s, chid, 1), jnp.float32)),
        grid_spec=pltpu.PrefetchScalarGridSpec(
            num_scalar_prefetch=0, grid=(n, mt_s),
            in_specs=[x_spec(t_stats), _const_spec(w1.shape)],
            out_specs=[stat_spec, stat_spec]),
        compiler_params=pltpu.CompilerParams(
            dimension_semantics=("parallel", "parallel"),
            vmem_limit_bytes=_vmem_limit(stats_tile_bytes)),
        cost_estimate=pl.CostEstimate(
            flops=2 * n * padded * cin * chid + 4 * n * padded * chid,
            transcendentals=0,
            bytes_accessed=x_bytes + 2 * n * mt_s * chid * 4),
    )(x_cm, w1)

    # Fold conv1 bias + BatchNorm (biased variance, training-mode stats) +
    # affine into one per-channel scale/shift; the conv1 bias cancels exactly
    # inside (h - mean).  Zero-padded tail contributes 0 to both partial sums,
    # so the statistics are over the real n*msp voxels.
    count = jnp.float32(n * msp)
    mean = jnp.sum(sums, axis=(0, 1)) / count                 # (Chid, 1)
    var = jnp.maximum(jnp.sum(sqs, axis=(0, 1)) / count - mean * mean, 0.0)
    scale = gamma * jax.lax.rsqrt(var + BN_EPS)               # (Chid, 1)
    shift = beta - mean * scale

    # Sweep 2: recompute W1 @ x per tile (32x4 weights -> recompute is free),
    # normalize, ReLU, second matmul.  Output write dominates HBM traffic.
    apply_tile_bytes = t_apply * (2 * cin * 4 + 2 * cout * 4
                                  + chid * 4 + chid * 2 + cout * 4)
    y = pl.pallas_call(
        _apply_kernel,
        out_shape=jax.ShapeDtypeStruct((n, cout, padded), jnp.float32),
        grid_spec=pltpu.PrefetchScalarGridSpec(
            num_scalar_prefetch=0, grid=(n, mt_a),
            in_specs=[x_spec(t_apply), _const_spec(w1.shape), _const_spec(scale.shape),
                      _const_spec(shift.shape), _const_spec(w2.shape),
                      _const_spec(b2.shape)],
            out_specs=pl.BlockSpec((1, cout, t_apply), lambda i, j: (i, 0, j))),
        compiler_params=pltpu.CompilerParams(
            dimension_semantics=("parallel", "parallel"),
            vmem_limit_bytes=_vmem_limit(apply_tile_bytes)),
        cost_estimate=pl.CostEstimate(
            flops=2 * n * padded * (cin * chid + chid * cout) + 4 * n * padded * chid,
            transcendentals=0,
            bytes_accessed=x_bytes + n * cout * padded * 4),
    )(x_cm, w1, scale, shift, w2, b2)
    if padded != msp:
        y = y[:, :, :msp]
    return y.reshape(n, cout, d, hh, ww)


# ---------------------------------------------------------------------------
# Pure-JAX f32 references mirroring PyTorch semantics.
# ---------------------------------------------------------------------------
def _reference_convmlp(x, params):
    n, cin = x.shape[0], x.shape[1]
    x2 = x.reshape(n, cin, -1).astype(jnp.float32)
    h = jnp.einsum("oc,ncm->nom", params["w1"], x2) + params["b1"][None, :, None]
    mean = jnp.mean(h, axis=(0, 2), keepdims=True)
    var = jnp.mean((h - mean) ** 2, axis=(0, 2), keepdims=True)
    h = (h - mean) * jax.lax.rsqrt(var + BN_EPS)
    h = h * params["gamma"][None, :, None] + params["beta"][None, :, None]
    h = jnp.maximum(h, 0.0)
    y = jnp.einsum("oc,ncm->nom", params["w2"], h) + params["b2"][None, :, None]
    return y.reshape((n, -1) + x.shape[2:])


def _reference_linear(x, params):
    n, cin = x.shape[0], x.shape[1]
    x2 = x.reshape(n, cin, -1).astype(jnp.float32)
    y = jnp.einsum("oc,ncm->nom", params["w"], x2) + params["b"][None, :, None]
    return y.reshape((n, -1) + x.shape[2:])


# ---------------------------------------------------------------------------
if __name__ == "__main__":
    # Small, module-consistent shapes: N=2, C_in=4, D=H=W=8, hidden=32, out=32.
    N, C_IN, D, H, W = 2, 4, 8, 8, 8
    C_HID, C_OUT = 32, 32

    key = jax.random.PRNGKey(0)
    kx, k1, k2, k3, k4, k5, k6, k7, k8 = jax.random.split(key, 9)

    x = jax.random.normal(kx, (N, C_IN, D, H, W), dtype=jnp.float32)

    # Conv3d k=1 weights in torch orientation (C_out, C_in); BN affine per channel.
    params = {
        "w1": jax.random.normal(k1, (C_HID, C_IN), jnp.float32) * 0.2,
        "b1": jax.random.normal(k2, (C_HID,), jnp.float32) * 0.1,
        "gamma": 1.0 + 0.05 * jax.random.normal(k3, (C_HID,), jnp.float32),
        "beta": 0.05 * jax.random.normal(k4, (C_HID,), jnp.float32),
        "w2": jax.random.normal(k5, (C_OUT, C_HID), jnp.float32) * 0.2,
        "b2": jax.random.normal(k6, (C_OUT,), jnp.float32) * 0.1,
    }

    out = jax.block_until_ready(projection_head_forward(x, params, mode="convmlp"))
    ref = _reference_convmlp(x, params)
    # bf16 MXU matmuls vs f32 reference -> loose tolerance.
    np.testing.assert_allclose(np.asarray(out), np.asarray(ref), rtol=5e-2, atol=5e-2)
    assert out.shape == (N, C_OUT, D, H, W)

    lin_params = {
        "w": jax.random.normal(k7, (C_OUT, C_IN), jnp.float32) * 0.2,
        "b": jax.random.normal(k8, (C_OUT,), jnp.float32) * 0.1,
    }
    out_lin = jax.block_until_ready(projection_head_forward(x, lin_params, mode="linear"))
    ref_lin = _reference_linear(x, lin_params)
    np.testing.assert_allclose(np.asarray(out_lin), np.asarray(ref_lin), rtol=5e-2, atol=5e-2)
    assert out_lin.shape == (N, C_OUT, D, H, W)

    # TODO(synk): BatchNorm3d running-mean/var (EMA) buffer update is a training
    # side effect with no output dependency; only forward batch-stat normalization
    # is implemented.
    print("KERNEL_OK")
</pallas_src>

<mosaic_0001>
module attributes {stable_mosaic.version = 11 : i64} {
  func.func @_stats_kernel(%arg0: i32, %arg1: i32, %arg2: memref<1x4x512xf32, #tpu.memory_space<vmem>>, %arg3: memref<32x4xbf16, #tpu.memory_space<vmem>>, %arg4: memref<1x1x32x1xf32, #tpu.memory_space<vmem>>, %arg5: memref<1x1x32x1xf32, #tpu.memory_space<vmem>>) attributes {dimension_semantics = [#tpu.dimension_semantics<parallel>, #tpu.dimension_semantics<parallel>], iteration_bounds = array<i64: 2, 1>, scalar_prefetch = 0 : i64, scratch_operands = 0 : i64, tpu.core_type = #tpu.core_type<tc>, window_params = [{transform_indices = @transform_0, window_bounds = array<i64: 1, 4, 512>}, {pipeline_mode = #tpu.pipeline_mode<synchronous>, transform_indices = @transform_1, window_bounds = array<i64: 32, 4>}, {transform_indices = @transform_2, window_bounds = array<i64: 1, 1, 32, 1>}, {transform_indices = @transform_3, window_bounds = array<i64: 1, 1, 32, 1>}]} {
    %c0 = arith.constant 0 : index
    %c0_0 = arith.constant 0 : index
    %c0_1 = arith.constant 0 : index
    %0 = vector.load %arg2[%c0, %c0_0, %c0_1] : memref<1x4x512xf32, #tpu.memory_space<vmem>>, vector<1x4x512xf32>
    %1 = vector.shape_cast %0 : vector<1x4x512xf32> to vector<4x512xf32>
    %2 = arith.truncf %1 : vector<4x512xf32> to vector<4x512xbf16>
    %c0_2 = arith.constant 0 : index
    %c0_3 = arith.constant 0 : index
    %3 = vector.load %arg3[%c0_2, %c0_3] : memref<32x4xbf16, #tpu.memory_space<vmem>>, vector<32x4xbf16>
    %cst = arith.constant dense<0.000000e+00> : vector<32x512xf32>
    %4 = tpu.matmul %3, %2, %cst {dimension_numbers = #tpu.dot_dimension_numbers<[1], [0], [0], [1], [0, 0, 1, 1], [], []>} : vector<32x4xbf16>, vector<4x512xbf16>, vector<32x512xf32> -> vector<32x512xf32>
    %cst_4 = arith.constant dense<0.000000e+00> : vector<32xf32>
    %5 = vector.multi_reduction <add>, %4, %cst_4 [1] : vector<32x512xf32> to vector<32xf32>
    %6 = vector.shape_cast %5 : vector<32xf32> to vector<32x1xf32>
    %c0_5 = arith.constant 0 : index
    %c0_6 = arith.constant 0 : index
    %c0_7 = arith.constant 0 : index
    %c0_8 = arith.constant 0 : index
    %7 = vector.load %arg4[%c0_5, %c0_6, %c0_7, %c0_8] : memref<1x1x32x1xf32, #tpu.memory_space<vmem>>, vector<1x1x32x1xf32>
    %8 = vector.shape_cast %7 : vector<1x1x32x1xf32> to vector<32x1xf32>
    %9 = vector.shape_cast %6 : vector<32x1xf32> to vector<1x1x32x1xf32>
    tpu.vector_store %arg4[%c0_5, %c0_6, %c0_7, %c0_8], %9 {strides = array<i32>} : memref<1x1x32x1xf32, #tpu.memory_space<vmem>>, vector<1x1x32x1xf32>,
    %10 = arith.mulf %4, %4 : vector<32x512xf32>
    %cst_9 = arith.constant dense<0.000000e+00> : vector<32xf32>
    %11 = vector.multi_reduction <add>, %10, %cst_9 [1] : vector<32x512xf32> to vector<32xf32>
    %12 = vector.shape_cast %11 : vector<32xf32> to vector<32x1xf32>
    %c0_10 = arith.constant 0 : index
    %c0_11 = arith.constant 0 : index
    %c0_12 = arith.constant 0 : index
    %c0_13 = arith.constant 0 : index
    %13 = vector.load %arg5[%c0_10, %c0_11, %c0_12, %c0_13] : memref<1x1x32x1xf32, #tpu.memory_space<vmem>>, vector<1x1x32x1xf32>
    %14 = vector.shape_cast %13 : vector<1x1x32x1xf32> to vector<32x1xf32>
    %15 = vector.shape_cast %12 : vector<32x1xf32> to vector<1x1x32x1xf32>
    tpu.vector_store %arg5[%c0_10, %c0_11, %c0_12, %c0_13], %15 {strides = array<i32>} : memref<1x1x32x1xf32, #tpu.memory_space<vmem>>, vector<1x1x32x1xf32>,
    return
  }
  func.func @transform_0(%arg0: i32, %arg1: i32) -> (i32, i32, i32) {
    %c0_i32 = arith.constant 0 : i32
    %c0_i32_0 = arith.constant 0 : i32
    return %arg0, %c0_i32, %arg1 : i32, i32, i32
  }
  func.func @transform_1(%arg0: i32, %arg1: i32) -> (i32, i32) {
    %c0_i32 = arith.constant 0 : i32
    %c0_i32_0 = arith.constant 0 : i32
    %c0_i32_1 = arith.constant 0 : i32
    return %c0_i32, %c0_i32_0 : i32, i32
  }
  func.func @transform_2(%arg0: i32, %arg1: i32) -> (i32, i32, i32, i32) {
    %c0_i32 = arith.constant 0 : i32
    %c0_i32_0 = arith.constant 0 : i32
    %c0_i32_1 = arith.constant 0 : i32
    return %arg0, %arg1, %c0_i32, %c0_i32_0 : i32, i32, i32, i32
  }
  func.func @transform_3(%arg0: i32, %arg1: i32) -> (i32, i32, i32, i32) {
    %c0_i32 = arith.constant 0 : i32
    %c0_i32_0 = arith.constant 0 : i32
    %c0_i32_1 = arith.constant 0 : i32
    return %arg0, %arg1, %c0_i32, %c0_i32_0 : i32, i32, i32, i32
  }
}

module attributes {stable_mosaic.version = 11 : i64} {
  func.func @_apply_kernel(%arg0: i32, %arg1: i32, %arg2: memref<1x4x512xf32, #tpu.memory_space<vmem>>, %arg3: memref<32x4xbf16, #tpu.memory_space<vmem>>, %arg4: memref<32x1xf32, #tpu.memory_space<vmem>>, %arg5: memref<32x1xf32, #tpu.memory_space<vmem>>, %arg6: memref<32x32xbf16, #tpu.memory_space<vmem>>, %arg7: memref<32x1xf32, #tpu.memory_space<vmem>>, %arg8: memref<1x32x512xf32, #tpu.memory_space<vmem>>) attributes {dimension_semantics = [#tpu.dimension_semantics<parallel>, #tpu.dimension_semantics<parallel>], iteration_bounds = array<i64: 2, 1>, scalar_prefetch = 0 : i64, scratch_operands = 0 : i64, tpu.core_type = #tpu.core_type<tc>, window_params = [{transform_indices = @transform_0, window_bounds = array<i64: 1, 4, 512>}, {pipeline_mode = #tpu.pipeline_mode<synchronous>, transform_indices = @transform_1, window_bounds = array<i64: 32, 4>}, {pipeline_mode = #tpu.pipeline_mode<synchronous>, transform_indices = @transform_2, window_bounds = array<i64: 32, 1>}, {pipeline_mode = #tpu.pipeline_mode<synchronous>, transform_indices = @transform_3, window_bounds = array<i64: 32, 1>}, {pipeline_mode = #tpu.pipeline_mode<synchronous>, transform_indices = @transform_4, window_bounds = array<i64: 32, 32>}, {pipeline_mode = #tpu.pipeline_mode<synchronous>, transform_indices = @transform_5, window_bounds = array<i64: 32, 1>}, {transform_indices = @transform_6, window_bounds = array<i64: 1, 32, 512>}]} {
    %c0 = arith.constant 0 : index
    %c0_0 = arith.constant 0 : index
    %c0_1 = arith.constant 0 : index
    %0 = vector.load %arg2[%c0, %c0_0, %c0_1] : memref<1x4x512xf32, #tpu.memory_space<vmem>>, vector<1x4x512xf32>
    %1 = vector.shape_cast %0 : vector<1x4x512xf32> to vector<4x512xf32>
    %2 = arith.truncf %1 : vector<4x512xf32> to vector<4x512xbf16>
    %c0_2 = arith.constant 0 : index
    %c0_3 = arith.constant 0 : index
    %3 = vector.load %arg3[%c0_2, %c0_3] : memref<32x4xbf16, #tpu.memory_space<vmem>>, vector<32x4xbf16>
    %cst = arith.constant dense<0.000000e+00> : vector<32x512xf32>
    %4 = tpu.matmul %3, %2, %cst {dimension_numbers = #tpu.dot_dimension_numbers<[1], [0], [0], [1], [0, 0, 1, 1], [], []>} : vector<32x4xbf16>, vector<4x512xbf16>, vector<32x512xf32> -> vector<32x512xf32>
    %c0_4 = arith.constant 0 : index
    %c0_5 = arith.constant 0 : index
    %5 = vector.load %arg4[%c0_4, %c0_5] : memref<32x1xf32, #tpu.memory_space<vmem>>, vector<32x1xf32>
    %6 = vector.broadcast %5 : vector<32x1xf32> to vector<32x512xf32>
    %7 = arith.mulf %4, %6 : vector<32x512xf32>
    %c0_6 = arith.constant 0 : index
    %c0_7 = arith.constant 0 : index
    %8 = vector.load %arg5[%c0_6, %c0_7] : memref<32x1xf32, #tpu.memory_space<vmem>>, vector<32x1xf32>
    %9 = vector.broadcast %8 : vector<32x1xf32> to vector<32x512xf32>
    %10 = arith.addf %7, %9 : vector<32x512xf32>
    %cst_8 = arith.constant 0.000000e+00 : f32
    %11 = vector.broadcast %cst_8 : f32 to vector<32x512xf32>
    %12 = arith.maximumf %10, %11 : vector<32x512xf32>
    %13 = arith.truncf %12 : vector<32x512xf32> to vector<32x512xbf16>
    %c0_9 = arith.constant 0 : index
    %c0_10 = arith.constant 0 : index
    %14 = vector.load %arg6[%c0_9, %c0_10] : memref<32x32xbf16, #tpu.memory_space<vmem>>, vector<32x32xbf16>
    %cst_11 = arith.constant dense<0.000000e+00> : vector<32x512xf32>
    %15 = tpu.matmul %14, %13, %cst_11 {dimension_numbers = #tpu.dot_dimension_numbers<[1], [0], [0], [1], [0, 0, 1, 1], [], []>} : vector<32x32xbf16>, vector<32x512xbf16>, vector<32x512xf32> -> vector<32x512xf32>
    %c0_12 = arith.constant 0 : index
    %c0_13 = arith.constant 0 : index
    %16 = vector.load %arg7[%c0_12, %c0_13] : memref<32x1xf32, #tpu.memory_space<vmem>>, vector<32x1xf32>
    %17 = vector.broadcast %16 : vector<32x1xf32> to vector<32x512xf32>
    %18 = arith.addf %15, %17 : vector<32x512xf32>
    %c0_14 = arith.constant 0 : index
    %c0_15 = arith.constant 0 : index
    %c0_16 = arith.constant 0 : index
    %19 = vector.load %arg8[%c0_14, %c0_15, %c0_16] : memref<1x32x512xf32, #tpu.memory_space<vmem>>, vector<1x32x512xf32>
    %20 = vector.shape_cast %19 : vector<1x32x512xf32> to vector<32x512xf32>
    %21 = vector.shape_cast %18 : vector<32x512xf32> to vector<1x32x512xf32>
    tpu.vector_store %arg8[%c0_14, %c0_15, %c0_16], %21 {strides = array<i32>} : memref<1x32x512xf32, #tpu.memory_space<vmem>>, vector<1x32x512xf32>,
    return
  }
  func.func @transform_0(%arg0: i32, %arg1: i32) -> (i32, i32, i32) {
    %c0_i32 = arith.constant 0 : i32
    %c0_i32_0 = arith.constant 0 : i32
    return %arg0, %c0_i32, %arg1 : i32, i32, i32
  }
  func.func @transform_1(%arg0: i32, %arg1: i32) -> (i32, i32) {
    %c0_i32 = arith.constant 0 : i32
    %c0_i32_0 = arith.constant 0 : i32
    %c0_i32_1 = arith.constant 0 : i32
    return %c0_i32, %c0_i32_0 : i32, i32
  }
  func.func @transform_2(%arg0: i32, %arg1: i32) -> (i32, i32) {
    %c0_i32 = arith.constant 0 : i32
    %c0_i32_0 = arith.constant 0 : i32
    %c0_i32_1 = arith.constant 0 : i32
    return %c0_i32, %c0_i32_0 : i32, i32
  }
  func.func @transform_3(%arg0: i32, %arg1: i32) -> (i32, i32) {
    %c0_i32 = arith.constant 0 : i32
    %c0_i32_0 = arith.constant 0 : i32
    %c0_i32_1 = arith.constant 0 : i32
    return %c0_i32, %c0_i32_0 : i32, i32
  }
  func.func @transform_4(%arg0: i32, %arg1: i32) -> (i32, i32) {
    %c0_i32 = arith.constant 0 : i32
    %c0_i32_0 = arith.constant 0 : i32
    %c0_i32_1 = arith.constant 0 : i32
    return %c0_i32, %c0_i32_0 : i32, i32
  }
  func.func @transform_5(%arg0: i32, %arg1: i32) -> (i32, i32) {
    %c0_i32 = arith.constant 0 : i32
    %c0_i32_0 = arith.constant 0 : i32
    %c0_i32_1 = arith.constant 0 : i32
    return %c0_i32, %c0_i32_0 : i32, i32
  }
  func.func @transform_6(%arg0: i32, %arg1: i32) -> (i32, i32, i32) {
    %c0_i32 = arith.constant 0 : i32
    %c0_i32_0 = arith.constant 0 : i32
    return %arg0, %c0_i32, %arg1 : i32, i32, i32
  }
}

</mosaic_0001>

<bundles_post_ra>
// kernel: projection_head_forward.3
= control target key start
LH: loop header
LB: loop body
LE: loop exit
PB: predicated region body
PF: predicated region fallthrough
CT: control target
= control target key end

     0   :  { %s922_s21 = smov 0   ;;  %s924_s22 = smov 0   ;;  %s1039_s0 = inlined_call_operand.vmem [shape: f32[2,4,512], index: 0, kind: input, shape index: {}]   ;;  %s1040_s1 = inlined_call_operand.vmem [shape: bf16[32,4], index: 1, kind: input, shape index: {}]   ;;  %s1041_s2 = inlined_call_operand.vmem [shape: f32[32,1], index: 2, kind: input, shape index: {}]   ;;  %s1042_s3 = inlined_call_operand.vmem [shape: f32[32,1], index: 3, kind: input, shape index: {}]   ;;  %s1043_s4 = inlined_call_operand.vmem [shape: bf16[32,32], index: 4, kind: input, shape index: {}]   ;;  %s1044_s5 = inlined_call_operand.vmem [shape: f32[32,1], index: 5, kind: input, shape index: {}]   ;;  %s1045_s6 = inlined_call_operand.vmem [shape: f32[2,32,512], index: 6, kind: output, shape index: {}]  }
   0x1   :  { %s926_s23 = smov 0  }
   0x2 LB: > { %s28_s24 = sadd.s32 1, %s880_s22  ;;  %p806_p0 = scmp.ge.s32.totalorder %s884_s23, 1  ;;  %s884_s23 = sphi %s926_s23, %s16_s23   ;;  %s880_s22 = sphi %s924_s22, %s1047_s22   ;;  %s876_s21 = sphi %s922_s21, %s1046_s21  }
   0x3   : > { %p30_p1 = scmp.ge.s32.totalorder %s28_s24, 2  ;;  %p233_p2 = scmp.lt.s32.totalorder %s884_s23, 3 }
   0x5   : > { %s1049_s24 = smov (%p30_p1, %s28_s24), 0  ;;  %p234_p3 = pnand %p806_p0, %p233_p2 }
   0x6   : > { %p272_p4 = scmp.lt.s32.totalorder (!%p234_p3), %s876_s21, 1  ;;  %v886_v0 = vmov (!%p234_p3), 0   ;;  %v444_v1 = vld [vmem:[%s1041_s2] sm:$0xff] (!%p234_p3)  ;;  %v445_v3 = vld [vmem:[%s1041_s2 + $0x8] sm:$0xff] (!%p234_p3)  ;;  %vm325_vm0 = vcmask (!%p234_p3), 1041408   ;;  %v446_v15 = vld [vmem:[%s1041_s2 + $0x10] sm:$0xff] (!%p234_p3) }
   0x7   : > { %237 = sbr.rel (%p234_p3) target bundleno = 487 (0x1e7), region = 44  ;;  %370 = vmatprep.mubr.bf16.mxu0 (!%p234_p3), %v886_v0  ;;  %423 = vmatprep.mubr.bf16.mxu1 (!%p234_p3), %v886_v0  ;;  %v484_v2 = vld [vmem:[%s1042_s3] sm:$0xff] (!%p234_p3)  ;;  %v485_v4 = vld [vmem:[%s1042_s3 + $0x8] sm:$0xff] (!%p234_p3)  ;;  %v447_v16 = vld [vmem:[%s1041_s2 + $0x18] sm:$0xff] (!%p234_p3)  ;;  %vm318_vm1 = vcmask (!%p234_p3), 31744   ;;  %vm586_vm2 = vcmask (!%p234_p3), 261120  }
   0x8   : > { %854 = vset.pattern.permute.xlu0 (!%p234_p3), %v886_v0  ;;  %855 = vset.pattern.permute.xlu1 (!%p234_p3), %v886_v0  ;;  %v858_v17 = vld [vmem:[%s1040_s1] sm:$0xff] (!%p234_p3)   ;;  %v486_v18 = vld [vmem:[%s1042_s3 + $0x10] sm:$0xff] (!%p234_p3)  ;;  %v487_v19 = vld [vmem:[%s1042_s3 + $0x18] sm:$0xff] (!%p234_p3) }
   0x9   : > { %450 = vperm.xlu0 (!%p234_p3), %854, %v444_v1   ;;  %490 = vperm.xlu1 (!%p234_p3), %855, %v484_v2   ;;  %v552_v20 = vld [vmem:[%s1044_s5] sm:$0xff] (!%p234_p3)  ;;  %v553_v21 = vld [vmem:[%s1044_s5 + $0x8] sm:$0xff] (!%p234_p3)  ;;  %v554_v23 = vld [vmem:[%s1044_s5 + $0x10] sm:$0xff] (!%p234_p3) }
   0xa   : > { %v859_v22 = vld [vmem:[%s1040_s1 + $0x8] sm:$0xff] (!%p234_p3)   ;;  %v555_v24 = vld [vmem:[%s1044_s5 + $0x18] sm:$0xff] (!%p234_p3) }
   0xd   : > { %455 = vperm.xlu0 (!%p234_p3), %854, %v445_v3   ;;  %495 = vperm.xlu1 (!%p234_p3), %855, %v485_v4  }
   0xe   : > { %s1051_s21 = smov (!%p272_p4, %s876_s21), 1 }
   0xf   : > { %s827_s29 = sshll.u32 %s1051_s21, 4  ;;  %s828_s17 = sshll.u32 %s1051_s21, 7 }
  0x10   : > { %s279_s10 = scalar_lea.vmem %s1039_s0, %s827_s29  ;;  %s1012_s20 = scalar_lea.vmem %s1045_s6, %s828_s17 }
  0x11   : > { %v292_v5 = vld [vmem:[%s279_s10] sm:$0xff]  ;;  %v293_v6 = vld [vmem:[%s279_s10 + $0x8] sm:$0xff]  ;;  %460 = vperm.xlu0 %854, %v446_v15   ;;  %465 = vperm.xlu1 %855, %v447_v16  }
  0x12   : > { %v296_v7 = vcombine.high %v292_v5, %v292_v5  ;;  %v297_v8 = vcombine.high %v293_v6, %v293_v6  ;;  %v300_v9 = vpack.c.bf16 %v292_v5, %v292_v5  ;;  %v302_v10 = vpack.c.bf16 %v293_v6, %v293_v6 }
  0x14   : > { %v301_v11 = vpack.c.bf16 %v296_v7, %v296_v7  ;;  %v303_v12 = vpack.c.bf16 %v297_v8, %v297_v8  ;;  %v327_v13 = vsel %vm325_vm0, %v300_v9, 0  ;;  %v333_v14 = vsel %vm325_vm0, %v302_v10, 0 }
  0x15   : > { %500 = vperm.xlu0 %854, %v486_v18   ;;  %505 = vperm.xlu1 %855, %v487_v19  }
  0x16   : > { %813 = vmatprep.subr.msk.bf16.mxu0 %vm325_vm0, %v301_v11  ;;  %816 = vmatprep.subr.msk.bf16.mxu1 %vm325_vm0, %v303_v12 }
  0x17   : > { %339 = vmatpush1.bf16.msra.mxu0 %v327_v13  ;;  %392 = vmatpush1.bf16.msra.mxu1 %v333_v14 }
  0x19   : > { %558 = vperm.xlu0 %854, %v552_v20   ;;  %563 = vperm.xlu1 %855, %v553_v21  }
  0x1a   : > { %814 = vmatmul.mubr.msk.bf16.vlgmr.msra.gmra.mrb[0].mxu0 %vm318_vm1, %v858_v17  ;;  %817 = vmatmul.mubr.msk.bf16.vlgmr.msra.gmra.mrb[0].mxu1 %vm318_vm1, %v858_v17 }
  0x1b   : > { %380 = vmatprep.mubr.bf16.mxu0 %v886_v0  ;;  %433 = vmatprep.mubr.bf16.mxu1 %v886_v0 }
  0x1d   : > { %568 = vperm.xlu0 %854, %v554_v23   ;;  %573 = vperm.xlu1 %855, %v555_v24  }
  0x22   : > { %815 = vmatmul.mubr.msk.bf16.gmra.mrb[4].mxu0 %vm318_vm1, %v859_v22  ;;  %818 = vmatmul.mubr.msk.bf16.gmra.mrb[4].mxu1 %vm318_vm1, %v859_v22 }
  0x23   : > { %625 = vmatprep.mubr.bf16.mxu0 %v886_v0  ;;  %678 = vmatprep.mubr.bf16.mxu1 %v886_v0 }
  0x88   : > { %v451_v25 = vpop.permute.xlu0 %450  ;;  %v491_v26 = vpop.permute.xlu1 %490 }
  0x8c   : > { %v456_v27 = vpop.permute.xlu0 %455  ;;  %v496_v28 = vpop.permute.xlu1 %495 }
  0x90   : > { %v461_v29 = vpop.permute.xlu0 %460  ;;  %v466_v52 = vpop.permute.xlu1 %465 }
  0x94   : > { %v501_v55 = vpop.permute.xlu0 %500  ;;  %v506_v21 = vpop.permute.xlu1 %505 }
  0xed   : > { %v372_v30 = vpop.f32.mrb[0].mxu0  ;;  %v425_v31 = vpop.f32.mrb[0].mxu1 }
  0xee   : > { %v468_v32 = vmul.f32 %v451_v25, %v372_v30  ;;  %v470_v33 = vmul.f32 %v451_v25, %v425_v31  ;;  %v374_v34 = vpop.f32.mrb[1].mxu0  ;;  %v427_v35 = vpop.f32.mrb[1].mxu1 }
  0xef   : > { %v469_v36 = vmul.f32 %v451_v25, %v374_v34  ;;  %v471_v37 = vmul.f32 %v451_v25, %v427_v35  ;;  %v376_v38 = vpop.f32.mrb[2].mxu0  ;;  %v429_v39 = vpop.f32.mrb[2].mxu1 }
  0xf0   : > { %v508_v40 = vadd.f32 %v491_v26, %v468_v32  ;;  %v510_v41 = vadd.f32 %v491_v26, %v470_v33  ;;  %v472_v42 = vmul.f32 %v456_v27, %v376_v38  ;;  %v474_v43 = vmul.f32 %v456_v27, %v429_v39  ;;  %v378_v44 = vpop.f32.mrb[3].mxu0  ;;  %v431_v45 = vpop.f32.mrb[3].mxu1 }
  0xf1   : > { %v509_v46 = vadd.f32 %v491_v26, %v469_v36  ;;  %v511_v47 = vadd.f32 %v491_v26, %v471_v37  ;;  %v473_v48 = vmul.f32 %v456_v27, %v378_v44  ;;  %v475_v49 = vmul.f32 %v456_v27, %v431_v45  ;;  %v559_v44 = vpop.permute.xlu0 %558  ;;  %v564_v45 = vpop.permute.xlu1 %563 }
  0xf2   : > { %v512_v50 = vadd.f32 %v496_v28, %v472_v42  ;;  %v514_v51 = vadd.f32 %v496_v28, %v474_v43  ;;  %v524_v56 = vmax.f32 %v508_v40, 0.0  ;;  %v526_v57 = vmax.f32 %v510_v41, 0.0  ;;  %v860_v42 = vld [vmem:[%s1043_s4] sm:$0xff]   ;;  %v861_v43 = vld [vmem:[%s1043_s4 + $0x8] sm:$0xff]  }
  0xf3   : > { %v513_v53 = vadd.f32 %v496_v28, %v473_v48  ;;  %v515_v54 = vadd.f32 %v496_v28, %v475_v49  ;;  %v525_v60 = vmax.f32 %v509_v46, 0.0  ;;  %v527_v61 = vmax.f32 %v511_v47, 0.0 }
  0xf4   : > { %v528_v58 = vmax.f32 %v512_v50, 0.0  ;;  %v530_v59 = vmax.f32 %v514_v51, 0.0 }
  0xf5   : > { %v529_v62 = vmax.f32 %v513_v53, 0.0  ;;  %v531_v63 = vmax.f32 %v515_v54, 0.0  ;;  %v382_v1 = vpop.f32.mrb[4].mxu0  ;;  %v435_v2 = vpop.f32.mrb[4].mxu1 }
  0xf6   : > { %v540_v3 = vpack.c.bf16 %v528_v58, %v524_v56  ;;  %v542_v4 = vpack.c.bf16 %v530_v59, %v526_v57  ;;  %v476_v5 = vmul.f32 %v461_v29, %v382_v1  ;;  %v478_v6 = vmul.f32 %v461_v29, %v435_v2  ;;  %v384_v7 = vpop.f32.mrb[5].mxu0  ;;  %v437_v8 = vpop.f32.mrb[5].mxu1 }
  0xf7   : > { %v477_v9 = vmul.f32 %v461_v29, %v384_v7  ;;  %v479_v10 = vmul.f32 %v461_v29, %v437_v8  ;;  %v386_v11 = vpop.f32.mrb[6].mxu0  ;;  %v439_v12 = vpop.f32.mrb[6].mxu1  ;;  %v541_v13 = vpack.c.bf16 %v529_v62, %v525_v60  ;;  %v543_v14 = vpack.c.bf16 %v531_v63, %v527_v61 }
  0xf8   : > { %v516_v15 = vadd.f32 %v501_v55, %v476_v5  ;;  %v518_v16 = vadd.f32 %v501_v55, %v478_v6  ;;  %v480_v17 = vmul.f32 %v466_v52, %v386_v11  ;;  %v482_v18 = vmul.f32 %v466_v52, %v439_v12  ;;  %v388_v19 = vpop.f32.mrb[7].mxu0  ;;  %v441_v20 = vpop.f32.mrb[7].mxu1 }
  0xf9   : > { %v517_v22 = vadd.f32 %v501_v55, %v477_v9  ;;  %v519_v23 = vadd.f32 %v501_v55, %v479_v10  ;;  %v481_v24 = vmul.f32 %v466_v52, %v388_v19  ;;  %v483_v25 = vmul.f32 %v466_v52, %v441_v20  ;;  %593 = vmatprep.subr.bf16.mxu0 %v541_v13  ;;  %v569_v61 = vpop.permute.xlu0 %568  ;;  %v574_v62 = vpop.permute.xlu1 %573 }
  0xfa   : > { %v520_v26 = vadd.f32 %v506_v21, %v480_v17  ;;  %v522_v27 = vadd.f32 %v506_v21, %v482_v18  ;;  %646 = vmatprep.subr.bf16.mxu1 %v543_v14  ;;  %594 = vmatpush1.bf16.msra.mxu0 %v540_v3  ;;  %v532_v30 = vmax.f32 %v516_v15, 0.0  ;;  %v534_v31 = vmax.f32 %v518_v16, 0.0 }
  0xfb   : > { %v521_v28 = vadd.f32 %v506_v21, %v481_v24  ;;  %v523_v29 = vadd.f32 %v506_v21, %v483_v25  ;;  %647 = vmatpush1.bf16.msra.mxu1 %v542_v4  ;;  %v533_v34 = vmax.f32 %v517_v22, 0.0  ;;  %v535_v35 = vmax.f32 %v519_v23, 0.0 }
  0xfc   : > { %v536_v32 = vmax.f32 %v520_v26, 0.0  ;;  %v538_v33 = vmax.f32 %v522_v27, 0.0 }
  0xfd   : > { %v537_v36 = vmax.f32 %v521_v28, 0.0  ;;  %v539_v37 = vmax.f32 %v523_v29, 0.0 }
  0xfe   : > { %v544_v38 = vpack.c.bf16 %v536_v32, %v532_v30  ;;  %v546_v39 = vpack.c.bf16 %v538_v33, %v534_v31 }
  0xff   : > { %v545_v40 = vpack.c.bf16 %v537_v36, %v533_v34  ;;  %v547_v41 = vpack.c.bf16 %v539_v37, %v535_v35 }
 0x101   : > { %595 = vmatprep.subr.bf16.mxu0 %v545_v40  ;;  %648 = vmatprep.subr.bf16.mxu1 %v547_v41 }
 0x102   : > { %596 = vmatpush1.bf16.msra.mxu0 %v544_v38  ;;  %649 = vmatpush1.bf16.msra.mxu1 %v546_v39 }
 0x105   : > { %821 = vmatmul.mubr.msk.bf16.vlgmr.msra.gmra.mrb[8].mxu0 %vm586_vm2, %v860_v42  ;;  %823 = vmatmul.mubr.msk.bf16.vlgmr.msra.gmra.mrb[8].mxu1 %vm586_vm2, %v860_v42 }
 0x106   : > { %635 = vmatprep.mubr.bf16.mxu0 %v886_v0  ;;  %688 = vmatprep.mubr.bf16.mxu1 %v886_v0 }
 0x10d   : > { %822 = vmatmul.mubr.msk.bf16.gmra.mrb[12].mxu0 %vm586_vm2, %v861_v43  ;;  %824 = vmatmul.mubr.msk.bf16.gmra.mrb[12].mxu1 %vm586_vm2, %v861_v43 }
 0x1d8   : > { %v627_v46 = vpop.f32.mrb[8].mxu0  ;;  %v680_v47 = vpop.f32.mrb[8].mxu1 }
 0x1d9   : > { %v628_v0 = vadd.f32 %v627_v46, %v559_v44  ;;  %v681_v48 = vadd.f32 %v680_v47, %v559_v44  ;;  %v629_v49 = vpop.f32.mrb[9].mxu0  ;;  %v682_v50 = vpop.f32.mrb[9].mxu1 }
 0x1da   : > { %v630_v51 = vadd.f32 %v629_v49, %v559_v44  ;;  %v683_v52 = vadd.f32 %v682_v50, %v559_v44  ;;  %v631_v53 = vpop.f32.mrb[10].mxu0  ;;  %v684_v54 = vpop.f32.mrb[10].mxu1 }
 0x1db   : > { %699 = vst [vmem:[%s1012_s20] sm:$0xff] %v628_v0  ;;  %701 = vst [vmem:[%s1012_s20 + $0x10] sm:$0xff] %v681_v48  ;;  %v632_v55 = vadd.f32 %v631_v53, %v564_v45  ;;  %v685_v56 = vadd.f32 %v684_v54, %v564_v45  ;;  %v633_v57 = vpop.f32.mrb[11].mxu0  ;;  %v686_v58 = vpop.f32.mrb[11].mxu1 }
 0x1dc   : > { %700 = vst [vmem:[%s1012_s20 + $0x8] sm:$0xff] %v630_v51  ;;  %702 = vst [vmem:[%s1012_s20 + $0x18] sm:$0xff] %v683_v52  ;;  %v634_v59 = vadd.f32 %v633_v57, %v564_v45  ;;  %v687_v60 = vadd.f32 %v686_v58, %v564_v45 }
 0x1dd   : > { %703 = vst [vmem:[%s1012_s20 + $0x20] sm:$0xff] %v632_v55  ;;  %705 = vst [vmem:[%s1012_s20 + $0x30] sm:$0xff] %v685_v56 }
 0x1de   : > { %704 = vst [vmem:[%s1012_s20 + $0x28] sm:$0xff] %v634_v59  ;;  %706 = vst [vmem:[%s1012_s20 + $0x38] sm:$0xff] %v687_v60 }
 0x1e0   : > { %v637_v63 = vpop.f32.mrb[12].mxu0  ;;  %v690_v1 = vpop.f32.mrb[12].mxu1 }
 0x1e1   : > { %v638_v2 = vadd.f32 %v637_v63, %v569_v61  ;;  %v691_v3 = vadd.f32 %v690_v1, %v569_v61  ;;  %v639_v4 = vpop.f32.mrb[13].mxu0  ;;  %v692_v5 = vpop.f32.mrb[13].mxu1 }
 0x1e2   : > { %v640_v6 = vadd.f32 %v639_v4, %v569_v61  ;;  %v693_v7 = vadd.f32 %v692_v5, %v569_v61  ;;  %v641_v8 = vpop.f32.mrb[14].mxu0  ;;  %v694_v9 = vpop.f32.mrb[14].mxu1 }
 0x1e3   : > { %707 = vst [vmem:[%s1012_s20 + $0x40] sm:$0xff] %v638_v2  ;;  %709 = vst [vmem:[%s1012_s20 + $0x50] sm:$0xff] %v691_v3  ;;  %v642_v10 = vadd.f32 %v641_v8, %v574_v62  ;;  %v695_v11 = vadd.f32 %v694_v9, %v574_v62  ;;  %v643_v12 = vpop.f32.mrb[15].mxu0  ;;  %v696_v13 = vpop.f32.mrb[15].mxu1 }
 0x1e4   : > { %708 = vst [vmem:[%s1012_s20 + $0x48] sm:$0xff] %v640_v6  ;;  %710 = vst [vmem:[%s1012_s20 + $0x58] sm:$0xff] %v693_v7  ;;  %v644_v14 = vadd.f32 %v643_v12, %v574_v62  ;;  %v697_v15 = vadd.f32 %v696_v13, %v574_v62 }
 0x1e5   : > { %711 = vst [vmem:[%s1012_s20 + $0x60] sm:$0xff] %v642_v10  ;;  %713 = vst [vmem:[%s1012_s20 + $0x70] sm:$0xff] %v695_v11 }
 0x1e6   : > { %712 = vst [vmem:[%s1012_s20 + $0x68] sm:$0xff] %v644_v14  ;;  %714 = vst [vmem:[%s1012_s20 + $0x78] sm:$0xff] %v697_v15 }
 0x1e7 PF: > { %s16_s23 = sadd.s32 1, %s884_s23   ;;  %s1046_s21 = smov %s880_s22 }
 0x1e8   : > { %p13_p5 = scmp.ge.s32.totalorder %s16_s23, 4   ;;  %s1047_s22 = smov %s1049_s24 }
 0x1ea   :  { %15 = sbr.rel (!%p13_p5) target bundleno = 2 (0x2), region = 74 }

// kernel: projection_head_forward.2
= control target key start
LH: loop header
LB: loop body
LE: loop exit
PB: predicated region body
PF: predicated region fallthrough
CT: control target
= control target key end

     0   :  { %s690_s12 = smov 0   ;;  %s692_s13 = smov 0   ;;  %s744_s0 = inlined_call_operand.vmem [shape: f32[2,4,512], index: 0, kind: input, shape index: {}]   ;;  %s745_s1 = inlined_call_operand.vmem [shape: bf16[32,4], index: 1, kind: input, shape index: {}]   ;;  %s746_s2 = inlined_call_operand.vmem [shape: f32[2,1,32,1], index: 2, kind: output, shape index: {0}]   ;;  %s747_s3 = inlined_call_operand.vmem [shape: f32[2,1,32,1], index: 3, kind: output, shape index: {1}]  }
   0x1   :  { %s694_s14 = smov 0  }
   0x2 LB: > { %s26_s15 = sadd.s32 1, %s663_s13  ;;  %p596_p0 = scmp.ge.s32.totalorder %s667_s14, 1  ;;  %s667_s14 = sphi %s694_s14, %s14_s14   ;;  %s663_s13 = sphi %s692_s13, %s749_s13   ;;  %s659_s12 = sphi %s690_s12, %s748_s12  }
   0x3   : > { %p28_p1 = scmp.ge.s32.totalorder %s26_s15, 2  ;;  %p163_p2 = scmp.lt.s32.totalorder %s667_s14, 3 }
   0x5   : > { %s751_s15 = smov (%p28_p1, %s26_s15), 0  ;;  %p164_p3 = pnand %p596_p0, %p163_p2 }
   0x6   : > { %p205_p4 = scmp.lt.s32.totalorder (!%p164_p3), %s659_s12, 1  ;;  %v669_v0 = vmov (!%p164_p3), 0   ;;  %vm266_vm0 = vcmask (!%p164_p3), 1041408   ;;  %v643_v11 = vld [vmem:[%s745_s1] sm:$0xff] (!%p164_p3)   ;;  %vm259_vm1 = vcmask (!%p164_p3), 31744   ;;  %v644_v12 = vld [vmem:[%s745_s1 + $0x8] sm:$0xff] (!%p164_p3)  }
   0x7   : > { %167 = sbr.rel (%p164_p3) target bundleno = 405 (0x195), region = 28  ;;  %311 = vmatprep.mubr.bf16.mxu0 (!%p164_p3), %v669_v0  ;;  %364 = vmatprep.mubr.bf16.mxu1 (!%p164_p3), %v669_v0  ;;  %vm405_vm2 = vcmask (!%p164_p3), 7168  }
   0xe   : > { %s753_s12 = smov (!%p205_p4, %s659_s12), 1 }
   0xf   : > { %s613_s16 = sshll.u32 %s753_s12, 4  ;;  %s614_s24 = sshll.u32 %s753_s12, 5 }
  0x10   : > { %s212_s19 = scalar_lea.vmem %s744_s0, %s613_s16  ;;  %s222_s27 = scalar_lea.vmem %s746_s2, %s614_s24 }
  0x11   : > { %v233_v1 = vld [vmem:[%s212_s19] sm:$0xff]  ;;  %v234_v2 = vld [vmem:[%s212_s19 + $0x8] sm:$0xff]  ;;  %s231_s30 = scalar_lea.vmem %s747_s3, %s614_s24 }
  0x12   : > { %v237_v3 = vcombine.high %v233_v1, %v233_v1  ;;  %v238_v4 = vcombine.high %v234_v2, %v234_v2  ;;  %v241_v5 = vpack.c.bf16 %v233_v1, %v233_v1  ;;  %v243_v6 = vpack.c.bf16 %v234_v2, %v234_v2 }
  0x14   : > { %v242_v7 = vpack.c.bf16 %v237_v3, %v237_v3  ;;  %v244_v8 = vpack.c.bf16 %v238_v4, %v238_v4  ;;  %v268_v9 = vsel %vm266_vm0, %v241_v5, 0  ;;  %v274_v10 = vsel %vm266_vm0, %v243_v6, 0 }
  0x16   : > { %605 = vmatprep.subr.msk.bf16.mxu0 %vm266_vm0, %v242_v7  ;;  %608 = vmatprep.subr.msk.bf16.mxu1 %vm266_vm0, %v244_v8 }
  0x17   : > { %280 = vmatpush1.bf16.msra.mxu0 %v268_v9  ;;  %333 = vmatpush1.bf16.msra.mxu1 %v274_v10 }
  0x1a   : > { %606 = vmatmul.mubr.msk.bf16.vlgmr.msra.gmra.mrb[0].mxu0 %vm259_vm1, %v643_v11  ;;  %609 = vmatmul.mubr.msk.bf16.vlgmr.msra.gmra.mrb[0].mxu1 %vm259_vm1, %v643_v11 }
  0x1b   : > { %321 = vmatprep.mubr.bf16.mxu0 %v669_v0  ;;  %374 = vmatprep.mubr.bf16.mxu1 %v669_v0 }
  0x22   : > { %607 = vmatmul.mubr.msk.bf16.gmra.mrb[4].mxu0 %vm259_vm1, %v644_v12  ;;  %610 = vmatmul.mubr.msk.bf16.gmra.mrb[4].mxu1 %vm259_vm1, %v644_v12 }
  0xed   : > { %v313_v13 = vpop.f32.mrb[0].mxu0  ;;  %v366_v14 = vpop.f32.mrb[0].mxu1 }
  0xee   : > { %v410_v15 = vmul.f32 %v313_v13, %v313_v13  ;;  %v315_v16 = vpop.f32.mrb[1].mxu0  ;;  %v368_v17 = vpop.f32.mrb[1].mxu1  ;;  %v412_v18 = vmul.f32 %v366_v14, %v366_v14 }
  0xef   : > { %v385_v19 = vadd.f32 %v315_v16, %v313_v13  ;;  %v411_v20 = vmul.f32 %v315_v16, %v315_v16  ;;  %v317_v21 = vpop.f32.mrb[2].mxu0  ;;  %v370_v22 = vpop.f32.mrb[2].mxu1  ;;  %v413_v29 = vmul.f32 %v368_v17, %v368_v17 }
  0xf0   : > { %v414_v23 = vmul.f32 %v317_v21, %v317_v21  ;;  %v319_v24 = vpop.f32.mrb[3].mxu0  ;;  %v372_v25 = vpop.f32.mrb[3].mxu1  ;;  %v416_v31 = vmul.f32 %v370_v22, %v370_v22 }
  0xf1   : > { %v426_v26 = vadd.f32 %v411_v20, %v410_v15  ;;  %v390_v27 = vadd.f32 %v319_v24, %v317_v21  ;;  %v415_v28 = vmul.f32 %v319_v24, %v319_v24  ;;  %v386_v30 = vadd.f32 %v385_v19, %v366_v14 }
  0xf2   : > { %v417_v36 = vmul.f32 %v372_v25, %v372_v25 }
  0xf3   : > { %v431_v32 = vadd.f32 %v415_v28, %v414_v23  ;;  %v391_v33 = vadd.f32 %v390_v27, %v370_v22  ;;  %v427_v34 = vadd.f32 %v426_v26, %v412_v18  ;;  %v387_v35 = vadd.f32 %v386_v30, %v368_v17 }
  0xf5   : > { %v376_v37 = vpop.f32.mrb[4].mxu1  ;;  %v323_v38 = vpop.f32.mrb[4].mxu0  ;;  %v432_v39 = vadd.f32 %v431_v32, %v416_v31  ;;  %v392_v40 = vadd.f32 %v391_v33, %v372_v25  ;;  %v428_v41 = vadd.f32 %v427_v34, %v413_v29  ;;  %388 = vadd.xlane.f32.xlu0 %v387_v35 }
  0xf6   : > { %v418_v42 = vmul.f32 %v323_v38, %v323_v38  ;;  %v325_v43 = vpop.f32.mrb[5].mxu0  ;;  %v378_v44 = vpop.f32.mrb[5].mxu1  ;;  %v420_v45 = vmul.f32 %v376_v37, %v376_v37 }
  0xf7   : > { %v395_v46 = vadd.f32 %v325_v43, %v323_v38  ;;  %v419_v47 = vmul.f32 %v325_v43, %v325_v43  ;;  %v327_v48 = vpop.f32.mrb[6].mxu0  ;;  %v380_v49 = vpop.f32.mrb[6].mxu1  ;;  %v433_v50 = vadd.f32 %v432_v39, %v417_v36  ;;  %v421_v57 = vmul.f32 %v378_v44, %v378_v44 }
  0xf8   : > { %v422_v51 = vmul.f32 %v327_v48, %v327_v48  ;;  %v329_v52 = vpop.f32.mrb[7].mxu0  ;;  %v382_v53 = vpop.f32.mrb[7].mxu1  ;;  %v424_v59 = vmul.f32 %v380_v49, %v380_v49 }
  0xf9   : > { %v436_v54 = vadd.f32 %v419_v47, %v418_v42  ;;  %v400_v55 = vadd.f32 %v329_v52, %v327_v48  ;;  %v423_v56 = vmul.f32 %v329_v52, %v329_v52  ;;  %434 = vadd.xlane.f32.xlu1 %v433_v50  ;;  %393 = vadd.xlane.f32.xlu0 %v392_v40 }
  0xfa   : > { %v396_v58 = vadd.f32 %v395_v46, %v376_v37  ;;  %v425_v1 = vmul.f32 %v382_v53, %v382_v53 }
  0xfb   : > { %v441_v60 = vadd.f32 %v423_v56, %v422_v51  ;;  %v401_v61 = vadd.f32 %v400_v55, %v380_v49  ;;  %v437_v62 = vadd.f32 %v436_v54, %v420_v45 }
  0xfc   : > { %v397_v63 = vadd.f32 %v396_v58, %v378_v44 }
  0xfd   : > { %v402_v0 = vadd.f32 %v401_v61, %v382_v53  ;;  %v438_v2 = vadd.f32 %v437_v62, %v421_v57  ;;  %v442_v3 = vadd.f32 %v441_v60, %v424_v59  ;;  %429 = vadd.xlane.f32.xlu0 %v428_v41 }
  0xfe   : > { %398 = vadd.xlane.f32.xlu1 %v397_v63 }
  0xff   : > { %v443_v4 = vadd.f32 %v442_v3, %v425_v1 }
 0x101   : > { %439 = vadd.xlane.f32.xlu0 %v438_v2 }
 0x102   : > { %403 = vadd.xlane.f32.xlu1 %v402_v0 }
 0x106   : > { %444 = vadd.xlane.f32.xlu1 %v443_v4 }
 0x182   : > { %v389_v5 = vpop.xlane.xlu0 %388 }
 0x183   : > { %406 = vst.msk [vmem:[%s222_s27] sm:$0xff] %vm405_vm2, %v389_v5 }
 0x186   : > { %v435_v6 = vpop.xlane.xlu1 %434  ;;  %v394_v7 = vpop.xlane.xlu0 %393 }
 0x187   : > { %447 = vst.msk [vmem:[%s231_s30 + $0x8] sm:$0xff] %vm405_vm2, %v435_v6  ;;  %407 = vst.msk [vmem:[%s222_s27 + $0x8] sm:$0xff] %vm405_vm2, %v394_v7 }
 0x18a   : > { %v430_v8 = vpop.xlane.xlu0 %429 }
 0x18b   : > { %v399_v9 = vpop.xlane.xlu1 %398  ;;  %446 = vst.msk [vmem:[%s231_s30] sm:$0xff] %vm405_vm2, %v430_v8 }
 0x18c   : > { %408 = vst.msk [vmem:[%s222_s27 + $0x10] sm:$0xff] %vm405_vm2, %v399_v9 }
 0x18e   : > { %v440_v10 = vpop.xlane.xlu0 %439 }
 0x18f   : > { %v404_v11 = vpop.xlane.xlu1 %403  ;;  %448 = vst.msk [vmem:[%s231_s30 + $0x10] sm:$0xff] %vm405_vm2, %v440_v10 }
 0x190   : > { %409 = vst.msk [vmem:[%s222_s27 + $0x18] sm:$0xff] %vm405_vm2, %v404_v11 }
 0x193   : > { %v445_v12 = vpop.xlane.xlu1 %444 }
 0x194   : > { %449 = vst.msk [vmem:[%s231_s30 + $0x18] sm:$0xff] %vm405_vm2, %v445_v12 }
 0x195 PF: > { %s14_s14 = sadd.s32 1, %s667_s14   ;;  %s748_s12 = smov %s663_s13 }
 0x196   : > { %p11_p5 = scmp.ge.s32.totalorder %s14_s14, 4   ;;  %s749_s13 = smov %s751_s15 }
 0x198   :  { %13 = sbr.rel (!%p11_p5) target bundleno = 2 (0x2), region = 70 }

</bundles_post_ra>
